<compile_context>
chip_gen: v5e
topology: v5e:2x2
jax: 0.10.0
libtpu: 0.0.40
codegen_flags: <defaults>
</compile_context>

<pallas_src>
import numpy as np
import jax
import jax.numpy as jnp
from jax.experimental import pallas as pl
from jax.experimental.pallas import tpu as pltpu


# Per-step slab budget.  Pallas double-buffers input and output, so live VMEM
# is ~4x the slab; 4 x 3 MiB = 12 MiB stays under the default scoped-VMEM
# limit on every generation (16 MiB v5e, 32 MiB v6e/v7x).
_SLAB_BUDGET_BYTES = 3 << 20
# Don't split a grid step below ~1 MiB: per-step overhead (~0.35 us) would
# start to dominate the DMA time, worst on v7x's 3.2 TB/s HBM.
_MIN_STEP_BYTES = 1 << 20


# ---------------------------------------------------------------------------
# Main path: x viewed as (B, H, W*C); one whole (H, W*C) slab per grid step.
# W-roll == lane roll by dW*C, H-roll == sublane roll by dH, one full store.
# ---------------------------------------------------------------------------
def _make_flat_kernel(d_h, d_wc):
    """out[h, wc] = x[(h - d_h) % H, (wc - d_wc) % (W*C)]  (== torch.roll)."""

    def kernel(x_ref, o_ref):
        x = x_ref[...]                       # (H, W*C)
        if d_wc:
            x = pltpu.roll(x, d_wc, axis=1)  # W-roll: XLU lane rotate
        if d_h:
            x = pltpu.roll(x, d_h, axis=0)   # H-roll: XLU sublane rotate
        o_ref[...] = x                       # single full-width unmasked store

    return kernel


def _flat_cyclic_shift(x, d_h, d_w, cost):
    B, H, W, C = x.shape
    WC = W * C
    xf = x.reshape(B, H, WC)                 # free: merges trailing dims
    out = pl.pallas_call(
        _make_flat_kernel(d_h, d_w * C),
        out_shape=jax.ShapeDtypeStruct((B, H, WC), x.dtype),
        grid=(B,),
        in_specs=[pl.BlockSpec((None, H, WC), lambda b: (b, 0, 0))],
        out_specs=pl.BlockSpec((None, H, WC), lambda b: (b, 0, 0)),
        compiler_params=pltpu.CompilerParams(
            dimension_semantics=("parallel",)),
        cost_estimate=cost,
    )(xf)
    return out.reshape(B, H, W, C)


# ---------------------------------------------------------------------------
# Fallback path (rare shapes): channel-tiled (1, H, W, c_blk) blocks.
# ---------------------------------------------------------------------------
def _make_tiled_kernel(H, W, d_h, d_w):
    def kernel(x_ref, o_ref):
        x = x_ref[...]                                   # (1, H, W, c_blk)
        # W-roll (sublane axis) in-register.
        if d_w:
            x = jnp.concatenate(
                [x[:, :, W - d_w:, :], x[:, :, :W - d_w, :]], axis=2)
        # H-roll: H is an outer axis, so two contiguous full-width stores.
        if d_h:
            o_ref[:, d_h:, :, :] = x[:, :H - d_h]
            o_ref[:, :d_h, :, :] = x[:, H - d_h:]
        else:
            o_ref[...] = x

    return kernel


def _choose_channel_block(B, H, W, C, itemsize):
    """Largest divisor of C whose (H, W, c_blk) slab fits the budget,
    preferring lane-dense multiples of 128; if that leaves < 4 grid steps,
    take a smaller lane-dense tile (still >= ~1 MiB/step) so both v7x
    TensorCores get work and the pipeline has steps in flight."""
    per_c = H * W * itemsize
    divs = [d for d in range(C, 0, -1)
            if C % d == 0 and per_c * d <= _SLAB_BUDGET_BYTES]
    if not divs:
        # TODO(synk): add H tiling for very large spatial slabs.
        raise NotImplementedError(
            "CyclicShift fallback: a single-channel (H, W) slab already "
            "exceeds the VMEM budget; H tiling not implemented.")
    lane_dense = [d for d in divs if d % 128 == 0]
    pool = lane_dense if lane_dense else divs
    c_blk = pool[0]                                      # largest admissible
    if B * (C // c_blk) < 4:
        for d in pool:                                   # descending
            if B * (C // d) >= 4 and per_c * d >= _MIN_STEP_BYTES:
                c_blk = d
                break
    return c_blk


def _tiled_cyclic_shift(x, d_h, d_w, cost):
    B, H, W, C = x.shape
    c_blk = _choose_channel_block(B, H, W, C, x.dtype.itemsize)
    n_c = C // c_blk
    block = (1, H, W, c_blk)
    return pl.pallas_call(
        _make_tiled_kernel(H, W, d_h, d_w),
        out_shape=jax.ShapeDtypeStruct(x.shape, x.dtype),
        grid=(B, n_c),
        in_specs=[pl.BlockSpec(block, lambda b, c: (b, 0, 0, c))],
        out_specs=pl.BlockSpec(block, lambda b, c: (b, 0, 0, c)),
        compiler_params=pltpu.CompilerParams(
            dimension_semantics=("parallel", "parallel")),
        cost_estimate=cost,
    )(x)


# ---------------------------------------------------------------------------
# Wrapper
# ---------------------------------------------------------------------------
def cyclic_shift(x, displacement):
    """Pallas TPU equivalent of CyclicShift.forward.

    x: (B, H, W, C) channels-last array.
    displacement: Python int (any sign), as stored by the PyTorch module.
    """
    B, H, W, C = x.shape
    d_h = int(displacement) % H        # torch.roll: out[i] = x[(i - d) % L]
    d_w = int(displacement) % W
    if d_h == 0 and d_w == 0:
        return x

    itemsize = x.dtype.itemsize
    cost = pl.CostEstimate(flops=0, transcendentals=0,
                           bytes_accessed=2 * x.size * itemsize)

    WC = W * C
    flat_slab = H * WC * itemsize
    # Flat path: lane axis = W*C (5376 for every real Swin stage, a multiple
    # of 128 even when C == 96); whole (H, W*C) slab per step.
    if WC % 128 == 0 and H % 8 == 0 and flat_slab <= _SLAB_BUDGET_BYTES:
        return _flat_cyclic_shift(x, d_h, d_w, cost)
    # Fallback: channel-tiled kernel for shapes the flat path can't take.
    return _tiled_cyclic_shift(x, d_h, d_w, cost)


# ---------------------------------------------------------------------------
# Test
# ---------------------------------------------------------------------------
if __name__ == "__main__":
    key = jax.random.PRNGKey(0)
    k1, k2 = jax.random.split(key)

    window_size = 7
    disp = window_size // 2                    # 3: "roll by 3 on dims 1, 2"

    # Case 1: deeper-stage-like shape, C a multiple of 128.  Swin applies
    # CyclicShift(-d) before attention and CyclicShift(+d) after — test both.
    B, H, W, C = 2, 16, 16, 128
    x = jax.random.normal(k1, (B, H, W, C), jnp.float32)
    out_fwd = cyclic_shift(x, disp)
    out_bwd = cyclic_shift(x, -disp)
    out_fwd, out_bwd = jax.block_until_ready((out_fwd, out_bwd))
    ref_fwd = jnp.roll(x, shift=(disp, disp), axis=(1, 2))
    ref_bwd = jnp.roll(x, shift=(-disp, -disp), axis=(1, 2))
    assert out_fwd.shape == x.shape and out_bwd.shape == x.shape
    np.testing.assert_array_equal(np.asarray(out_fwd), np.asarray(ref_fwd))
    np.testing.assert_array_equal(np.asarray(out_bwd), np.asarray(ref_bwd))

    # Case 2: stage-1-like channel count C=96 (not a multiple of 128); the
    # flattened W*C lane axis (768 here, 5376 in real Swin) stays lane-dense.
    B2, H2, W2, C2 = 2, 8, 8, 96
    x2 = jax.random.normal(k2, (B2, H2, W2, C2), jnp.float32)
    out2 = jax.block_until_ready(cyclic_shift(x2, disp))
    ref2 = jnp.roll(x2, shift=(disp, disp), axis=(1, 2))
    np.testing.assert_array_equal(np.asarray(out2), np.asarray(ref2))

    print("KERNEL_OK")
</pallas_src>

<mosaic_0001>
module attributes {stable_mosaic.version = 11 : i64} {
  func.func @kernel(%arg0: i32, %arg1: memref<1x16x2048xf32, #tpu.memory_space<vmem>>, %arg2: memref<1x16x2048xf32, #tpu.memory_space<vmem>>) attributes {dimension_semantics = [#tpu.dimension_semantics<parallel>], iteration_bounds = array<i64: 2>, scalar_prefetch = 0 : i64, scratch_operands = 0 : i64, tpu.core_type = #tpu.core_type<tc>, window_params = [{transform_indices = @transform_0, window_bounds = array<i64: 1, 16, 2048>}, {transform_indices = @transform_1, window_bounds = array<i64: 1, 16, 2048>}]} {
    %c0 = arith.constant 0 : index
    %c0_0 = arith.constant 0 : index
    %c0_1 = arith.constant 0 : index
    %0 = vector.load %arg1[%c0, %c0_0, %c0_1] : memref<1x16x2048xf32, #tpu.memory_space<vmem>>, vector<1x16x2048xf32>
    %1 = vector.shape_cast %0 : vector<1x16x2048xf32> to vector<16x2048xf32>
    %c384_i32 = arith.constant 384 : i32
    %2 = tpu.dynamic_rotate %1 by %c384_i32 dim 1 : vector<16x2048xf32>, i32 -> vector<16x2048xf32>
    %c3_i32 = arith.constant 3 : i32
    %3 = tpu.dynamic_rotate %2 by %c3_i32 dim 0 : vector<16x2048xf32>, i32 -> vector<16x2048xf32>
    %c0_2 = arith.constant 0 : index
    %c0_3 = arith.constant 0 : index
    %c0_4 = arith.constant 0 : index
    %4 = vector.load %arg2[%c0_2, %c0_3, %c0_4] : memref<1x16x2048xf32, #tpu.memory_space<vmem>>, vector<1x16x2048xf32>
    %5 = vector.shape_cast %4 : vector<1x16x2048xf32> to vector<16x2048xf32>
    %6 = vector.shape_cast %3 : vector<16x2048xf32> to vector<1x16x2048xf32>
    tpu.vector_store %arg2[%c0_2, %c0_3, %c0_4], %6 {strides = array<i32>} : memref<1x16x2048xf32, #tpu.memory_space<vmem>>, vector<1x16x2048xf32>,
    return
  }
  func.func @transform_0(%arg0: i32) -> (i32, i32, i32) {
    %c0_i32 = arith.constant 0 : i32
    %c0_i32_0 = arith.constant 0 : i32
    %c0_i32_1 = arith.constant 0 : i32
    return %arg0, %c0_i32, %c0_i32_0 : i32, i32, i32
  }
  func.func @transform_1(%arg0: i32) -> (i32, i32, i32) {
    %c0_i32 = arith.constant 0 : i32
    %c0_i32_0 = arith.constant 0 : i32
    %c0_i32_1 = arith.constant 0 : i32
    return %arg0, %c0_i32, %c0_i32_0 : i32, i32, i32
  }
}

</mosaic_0001>

<bundles_post_ra>
// kernel: tpu_custom_call.1
= control target key start
LH: loop header
LB: loop body
LE: loop exit
PB: predicated region body
PF: predicated region fallthrough
CT: control target
= control target key end

     0   :  { %6 = vsyncpa [#allocation3], 0  ;;  %s947_s0 = inlined_call_operand.hbm [shape: f32[2,16,2048], index: 0, kind: input, shape index: {}]   ;;  %s948_s1 = inlined_call_operand.hbm [shape: f32[2,16,2048], index: 1, kind: output, shape index: {}]  }
   0x1   :  { %8 = vsyncpa [#allocation3 + $0x1], 0 }
   0x2   :  { %9 = vsyncpa [#allocation4], 0 }
   0x3   :  { %11 = vsyncpa [#allocation4 + $0x1], 0  ;;  %s535_s6 = smov 0   ;;  %s537_s7 = smov 0  }
   0x4   :  { %s539_s8 = smov 0   ;;  %s541_s9 = smov 0  }
   0x5 LB: > { %s556_s10 = sadd.s32 4294967295, %s519_s9   ;;  %s357_s11 = sadd.s32 4294967294, %s519_s9   ;;  %s519_s9 = sphi %s541_s9, %s958_s9   ;;  %s515_s8 = sphi %s539_s8, %s957_s8   ;;  %s511_s7 = sphi %s537_s7, %s956_s7   ;;  %s507_s6 = sphi %s535_s6, %s955_s6  }
   0x6   : > { %s560_s12 = sadd.s32 1, %s519_s9   ;;  %s24_s13 = sadd.s32 1, %s515_s8 }
   0x7   : > { %s21_s14 = ssub.s32 %s519_s9, %s560_s12  ;;  %p31_p0 = scmp.ne.s32.totalorder %s515_s8, %s511_s7 }
   0x8   : > { %p22_p1 = scmp.eq.s32.totalorder %s21_s14, 0  ;;  %p32_p2 = scmp.eq.s32.totalorder %s519_s9, 0 }
   0x9   : > { %p37_p3 = scmp.ne.s32.totalorder %s511_s7, %s507_s6  ;;  %p38_p4 = scmp.eq.s32.totalorder %s556_s10, 0 }
   0xa   : > { %s572_s15 = scalar_select %p22_p1, %s515_s8, %s24_s13  }
   0xb   : > { %p574_p5 = por %p32_p2, %p31_p0  ;;  %p578_p6 = por %p38_p4, %p37_p3 }
   0xc   : > { %p61_p7 = scmp.eq.s32.totalorder %s556_s10, 1  ;;  %p67_p8 = scmp.eq.s32.totalorder %s357_s11, 1 }
   0xd   : > { %p385_p10 = scmp.lt.s32.totalorder %s519_s9, 2  ;;  %s87_s20 = sand.u32 1, %s515_s8  }
   0xe   : > { %p585_p11 = por %p61_p7, %p31_p0  ;;  %p589_p12 = por %p67_p8, %p37_p3 }
   0xf   : > { %s371_s21 = sshll.u32 %s519_s9, 8  ;;  %s360_s22 = sshll.u32 %s87_s20, 8 }
  0x10   : > { %s96_s25 = scalar_lea.hbm %s947_s0, %s371_s21  ;;  %s91_s27 = scalar_lea.vmem [#allocation2], %s360_s22 }
  0x11   : > { %s97_s26 = sshll.u32 %s96_s25, 4  ;;  %s99_s28 = sshll.u32 %s91_s27, 4  ;;  %s98_s26 = int_to_ptr.hbm [resolvable:$true] %s97_s26  ;;  %s100_s28 = int_to_ptr.vmem [resolvable:$true] %s99_s28 }
  0x12   : > { %p600_p13 = pnand %p385_p10, %p574_p5  ;;  %p363_p0 = scmp.ge.s32.totalorder %s519_s9, 1 }
  0x13   : > { %p107_p1 = scmp.lt.s32.totalorder %s519_s9, 3  ;;  %s88_s30 = scalar_lea.sflag [#allocation3], %s87_s20 }
  0x14   : > { %s423_s2 = sshra.s32 %s98_s26, 4  ;;  %p427_p3 = pneg %p600_p13  ;;  %s424_s2 = int_to_ptr.hbm [resolvable:$true] %s423_s2 }
  0x15   : > { %s425_s3 = scalar_lea.hbm %s424_s2, 256  ;;  %s430_s11 = scalar_lea.hbm %s947_s0, 512 }
  0x16   : > { %p426_p2 = scmp.ne.s32.totalorder %s424_s2, %s425_s3  ;;  %p431_p5 = scmp.lt.s32.totalorder %s424_s2, %s947_s0 }
  0x17   : > { %p432_p8 = scmp.lt.s32.totalorder %s430_s11, %s425_s3 }
  0x18   : > { %p428_p4 = pnand %p427_p3, %p426_p2 }
  0x19   : > { %p433_p10 = por %p432_p8, %p431_p5 }
  0x1a   : > { %p429_p7 = pneg %p428_p4 }
  0x1c   : > { %p434_p9 = pnand %p433_p10, %p429_p7 }
  0x1e   : > { %437 = shalt.err (!%p434_p9)
}
  0x1f   : > { %s521_s16 = smov 2048   ;;  %s522_s20 = smov 128  }
  0x20   : > { %380 = dma.hbm_to_vmem [thread:$0]  (!%p600_p13), %s98_s26, 4096, %s100_s28, %s88_s30, %s521_s16, %s521_s16, %s522_s20  }
  0x21   : > { %p108_p2 = pnand %p363_p0, %p107_p1 }
  0x22   : > { %s621_s21 = sand.u32 (!%p108_p2), 1, %s511_s7  }
  0x23   : > { %111 = sbr.rel (%p108_p2) target bundleno = 82 (0x52), region = 24  ;;  %s364_s22 = sshll.u32 (!%p108_p2), %s621_s21, 8 }
  0x24   : > { %s114_s23 = scalar_lea.sflag (!%p108_p2), [#allocation3], %s621_s21  ;;  %s627_s24 = scalar_lea.vmem (!%p108_p2), [#allocation2], %s364_s22 }
  0x28   : > { %498 = dma.done.wait (%p578_p6), %s114_s23, 4096  }
  0x29   : > { %500 = vsyncadd (%p578_p6), %s114_s23, 4294963200  ;;  %v201_v0 = vlaneseq  ;;  %v636_v2 = vld [vmem:[%s627_s24 + $0x68] sm:$0xff]  ;;  %v643_v4 = vld [vmem:[%s627_s24 + $0x70] sm:$0xff]  ;;  %s689_s17 = scalar_lea.vmem [#allocation5], %s364_s22  ;;  %s372_s25 = sshll.u32 %s556_s10, 8 }
  0x2a   : > { %v639_v3 = vld [vmem:[%s627_s24 + $0xe8] sm:$0xff]  ;;  %v169_v5 = vrot.slane %v636_v2, 5  ;;  %v648_v7 = vld [vmem:[%s627_s24 + $0xf0] sm:$0xff]  ;;  %v170_v8 = vrot.slane %v643_v4, 5  ;;  %v652_v9 = vld [vmem:[%s627_s24 + $0x78] sm:$0xff]  ;;  %s280_s27 = scalar_lea.hbm %s948_s1, %s372_s25  ;;  %s281_s28 = sshll.u32 %s689_s17, 4  ;;  %s282_s28 = int_to_ptr.vmem [resolvable:$true] %s281_s28 }
  0x2b   : > { %v633_v1 = vshrl.u32 %v201_v0, 7  ;;  %v185_v6 = vrot.slane %v639_v3, 5  ;;  %v655_v10 = vld [vmem:[%s627_s24 + $0xf8] sm:$0xff]  ;;  %v186_v11 = vrot.slane %v648_v7, 5  ;;  %v171_v12 = vrot.slane %v652_v9, 5  ;;  %v661_v14 = vld [vmem:[%s627_s24] sm:$0xff] }
  0x2c   : > { %v187_v13 = vrot.slane %v655_v10, 5  ;;  %v664_v15 = vld [vmem:[%s627_s24 + $0x80] sm:$0xff]  ;;  %v667_v16 = vld [vmem:[%s627_s24 + $0x8] sm:$0xff]  ;;  %v172_v18 = vrot.slane %v661_v14, 5  ;;  %v682_v22 = vld [vmem:[%s627_s24 + $0x10] sm:$0xff]  ;;  %s283_s29 = sshll.u32 %s280_s27, 4  ;;  %s284_s29 = int_to_ptr.hbm [resolvable:$true] %s283_s29 }
  0x2d   : > { %vm203_vm0 = vcmp.lt.s32.totalorder %v633_v1, 3  ;;  %v188_v19 = vrot.slane %v664_v15, 5  ;;  %v678_v20 = vld [vmem:[%s627_s24 + $0x88] sm:$0xff]  ;;  %v173_v21 = vrot.slane %v667_v16, 5  ;;  %v685_v23 = vld [vmem:[%s627_s24 + $0x90] sm:$0xff]  ;;  %v174_v27 = vrot.slane %v682_v22, 5 }
  0x2e   : > { %v220_v17 = vsel %vm203_vm0, %v185_v6, %v169_v5  ;;  %v221_v24 = vsel %vm203_vm0, %v186_v11, %v170_v8  ;;  %v222_v25 = vsel %vm203_vm0, %v187_v13, %v171_v12  ;;  %v189_v26 = vrot.slane %v678_v20, 5  ;;  %v707_v28 = vld [vmem:[%s627_s24 + $0x18] sm:$0xff]  ;;  %v713_v30 = vld [vmem:[%s627_s24 + $0x20] sm:$0xff]  ;;  %v729_v36 = vld [vmem:[%s627_s24 + $0x28] sm:$0xff]  ;;  %s269_s30 = scalar_lea.sflag [#allocation4], %s621_s21  ;;  %s467_s2 = sshra.s32 %s284_s29, 4  ;;  %s468_s2 = int_to_ptr.hbm [resolvable:$true] %s467_s2 }
  0x2f   : > { %236 = vst [vmem:[%s689_s17] sm:$0xff] %v220_v17  ;;  %v710_v29 = vld [vmem:[%s627_s24 + $0x98] sm:$0xff]  ;;  %v223_v31 = vsel %vm203_vm0, %v188_v19, %v172_v18  ;;  %v190_v32 = vrot.slane %v685_v23, 5  ;;  %v175_v33 = vrot.slane %v707_v28, 5  ;;  %v726_v35 = vld [vmem:[%s627_s24 + $0xa0] sm:$0xff]  ;;  %v176_v38 = vrot.slane %v713_v30, 5  ;;  %v741_v40 = vld [vmem:[%s627_s24 + $0xa8] sm:$0xff]  ;;  %p474_p0 = scmp.lt.s32.totalorder %s468_s2, %s948_s1 }
  0x30   : > { %237 = vst [vmem:[%s689_s17 + $0x8] sm:$0xff] %v221_v24  ;;  %v191_v34 = vrot.slane %v710_v29, 5  ;;  %v224_v37 = vsel %vm203_vm0, %v189_v26, %v173_v21  ;;  %v192_v39 = vrot.slane %v726_v35, 5  ;;  %v177_v41 = vrot.slane %v729_v36, 5  ;;  %v745_v42 = vld [vmem:[%s627_s24 + $0x30] sm:$0xff]  ;;  %v766_v48 = vld [vmem:[%s627_s24 + $0x38] sm:$0xff] }
  0x31   : > { %238 = vst [vmem:[%s689_s17 + $0x10] sm:$0xff] %v222_v25  ;;  %v225_v43 = vsel %vm203_vm0, %v190_v32, %v174_v27  ;;  %v193_v45 = vrot.slane %v741_v40, 5  ;;  %v762_v46 = vld [vmem:[%s627_s24 + $0xb0] sm:$0xff]  ;;  %v178_v47 = vrot.slane %v745_v42, 5  ;;  %v769_v49 = vld [vmem:[%s627_s24 + $0xb8] sm:$0xff]  ;;  %v179_v52 = vrot.slane %v766_v48, 5 }
  0x32   : > { %239 = vst [vmem:[%s689_s17 + $0x18] sm:$0xff] %v223_v31  ;;  %v226_v44 = vsel %vm203_vm0, %v191_v34, %v175_v33  ;;  %v227_v50 = vsel %vm203_vm0, %v192_v39, %v176_v38  ;;  %v194_v51 = vrot.slane %v762_v46, 5  ;;  %v195_v53 = vrot.slane %v769_v49, 5  ;;  %v782_v54 = vld [vmem:[%s627_s24 + $0x40] sm:$0xff]  ;;  %v146_v59 = vld [vmem:[%s627_s24 + $0x48] sm:$0xff]  ;;  %v147_v61 = vld [vmem:[%s627_s24 + $0x50] sm:$0xff] }
  0x33   : > { %240 = vst [vmem:[%s689_s17 + $0x20] sm:$0xff] %v224_v37  ;;  %v161_v55 = vld [vmem:[%s627_s24 + $0xc0] sm:$0xff]  ;;  %v228_v56 = vsel %vm203_vm0, %v193_v45, %v177_v41  ;;  %v180_v57 = vrot.slane %v782_v54, 5  ;;  %v162_v60 = vld [vmem:[%s627_s24 + $0xc8] sm:$0xff]  ;;  %v181_v63 = vrot.slane %v146_v59, 5  ;;  %v163_v17 = vld [vmem:[%s627_s24 + $0xd0] sm:$0xff]  ;;  %v206_v2 = vsel %vm203_vm0, %v171_v12, %v187_v13 }
  0x34   : > { %241 = vst [vmem:[%s689_s17 + $0x28] sm:$0xff] %v225_v43  ;;  %v196_v58 = vrot.slane %v161_v55, 5  ;;  %v229_v62 = vsel %vm203_vm0, %v194_v51, %v178_v47  ;;  %v197_v0 = vrot.slane %v162_v60, 5  ;;  %v148_v24 = vld [vmem:[%s627_s24 + $0x58] sm:$0xff]  ;;  %v230_v31 = vsel %vm203_vm0, %v195_v53, %v179_v52  ;;  %v149_v46 = vld [vmem:[%s627_s24 + $0x60] sm:$0xff]  ;;  %s469_s3 = scalar_lea.hbm %s468_s2, 256 }
  0x35   : > { %242 = vst [vmem:[%s689_s17 + $0x30] sm:$0xff] %v226_v44  ;;  %v164_v25 = vld [vmem:[%s627_s24 + $0xd8] sm:$0xff]  ;;  %v182_v37 = vrot.slane %v147_v61, 5  ;;  %v198_v43 = vrot.slane %v163_v17, 5  ;;  %v183_v44 = vrot.slane %v148_v24, 5  ;;  %v165_v48 = vld [vmem:[%s627_s24 + $0xe0] sm:$0xff]  ;;  %v205_v17 = vsel %vm203_vm0, %v170_v8, %v186_v11  ;;  %p470_p6 = scmp.ne.s32.totalorder %s468_s2, %s469_s3 }
  0x36   : > { %243 = vst [vmem:[%s689_s17 + $0x38] sm:$0xff] %v227_v50  ;;  %v231_v49 = vsel %vm203_vm0, %v196_v58, %v180_v57  ;;  %v199_v54 = vrot.slane %v164_v25, 5  ;;  %v184_v55 = vrot.slane %v149_v46, 5  ;;  %v200_v50 = vrot.slane %v165_v48, 5  ;;  %s473_s11 = scalar_lea.hbm %s948_s1, 512 }
  0x37   : > { %244 = vst [vmem:[%s689_s17 + $0x40] sm:$0xff] %v228_v56  ;;  %v232_v59 = vsel %vm203_vm0, %v197_v0, %v181_v63  ;;  %v233_v60 = vsel %vm203_vm0, %v198_v43, %v182_v37  ;;  %v207_v3 = vsel %vm203_vm0, %v172_v18, %v188_v19  ;;  %v208_v4 = vsel %vm203_vm0, %v173_v21, %v189_v26  ;;  %p471_p9 = pnand %p470_p6, %p585_p11  ;;  %p475_p1 = scmp.lt.s32.totalorder %s473_s11, %s469_s3 }
  0x38   : > { %245 = vst [vmem:[%s689_s17 + $0x48] sm:$0xff] %v229_v62  ;;  %v234_v56 = vsel %vm203_vm0, %v199_v54, %v183_v44  ;;  %v235_v61 = vsel %vm203_vm0, %v200_v50, %v184_v55  ;;  %v204_v62 = vsel %vm203_vm0, %v169_v5, %v185_v6  ;;  %v209_v5 = vsel %vm203_vm0, %v174_v27, %v190_v32 }
  0x39   : > { %246 = vst [vmem:[%s689_s17 + $0x50] sm:$0xff] %v230_v31  ;;  %v210_v6 = vsel %vm203_vm0, %v175_v33, %v191_v34  ;;  %v211_v7 = vsel %vm203_vm0, %v176_v38, %v192_v39  ;;  %v212_v8 = vsel %vm203_vm0, %v177_v41, %v193_v45  ;;  %v213_v9 = vsel %vm203_vm0, %v178_v47, %v194_v51  ;;  %p472_p13 = pneg %p471_p9  ;;  %p476_p3 = por %p475_p1, %p474_p0 }
  0x3a   : > { %247 = vst [vmem:[%s689_s17 + $0x58] sm:$0xff] %v231_v49  ;;  %v214_v10 = vsel %vm203_vm0, %v179_v52, %v195_v53  ;;  %v215_v11 = vsel %vm203_vm0, %v180_v57, %v196_v58  ;;  %v216_v12 = vsel %vm203_vm0, %v181_v63, %v197_v0  ;;  %v217_v13 = vsel %vm203_vm0, %v182_v37, %v198_v43 }
  0x3b   : > { %248 = vst [vmem:[%s689_s17 + $0x60] sm:$0xff] %v232_v59  ;;  %v218_v14 = vsel %vm203_vm0, %v183_v44, %v199_v54  ;;  %v219_v15 = vsel %vm203_vm0, %v184_v55, %v200_v50  ;;  %p477_p4 = pnand %p476_p3, %p472_p13 }
  0x3c   : > { %249 = vst [vmem:[%s689_s17 + $0x68] sm:$0xff] %v233_v60 }
  0x3d   : > { %250 = vst [vmem:[%s689_s17 + $0x70] sm:$0xff] %v234_v56 }
  0x3e   : > { %251 = vst [vmem:[%s689_s17 + $0x78] sm:$0xff] %v235_v61 }
  0x3f   : > { %252 = vst [vmem:[%s689_s17 + $0x80] sm:$0xff] %v204_v62 }
  0x40   : > { %253 = vst [vmem:[%s689_s17 + $0x88] sm:$0xff] %v205_v17 }
  0x41   : > { %254 = vst [vmem:[%s689_s17 + $0x90] sm:$0xff] %v206_v2 }
  0x42   : > { %255 = vst [vmem:[%s689_s17 + $0x98] sm:$0xff] %v207_v3 }
  0x43   : > { %256 = vst [vmem:[%s689_s17 + $0xa0] sm:$0xff] %v208_v4 }
  0x44   : > { %257 = vst [vmem:[%s689_s17 + $0xa8] sm:$0xff] %v209_v5 }
  0x45   : > { %258 = vst [vmem:[%s689_s17 + $0xb0] sm:$0xff] %v210_v6 }
  0x46   : > { %259 = vst [vmem:[%s689_s17 + $0xb8] sm:$0xff] %v211_v7 }
  0x47   : > { %260 = vst [vmem:[%s689_s17 + $0xc0] sm:$0xff] %v212_v8 }
  0x48   : > { %261 = vst [vmem:[%s689_s17 + $0xc8] sm:$0xff] %v213_v9 }
  0x49   : > { %262 = vst [vmem:[%s689_s17 + $0xd0] sm:$0xff] %v214_v10 }
  0x4a   : > { %263 = vst [vmem:[%s689_s17 + $0xd8] sm:$0xff] %v215_v11 }
  0x4b   : > { %264 = vst [vmem:[%s689_s17 + $0xe0] sm:$0xff] %v216_v12 }
  0x4c   : > { %265 = vst [vmem:[%s689_s17 + $0xe8] sm:$0xff] %v217_v13 }
  0x4d   : > { %266 = vst [vmem:[%s689_s17 + $0xf0] sm:$0xff] %v218_v14 }
  0x4e   : > { %267 = vst [vmem:[%s689_s17 + $0xf8] sm:$0xff] %v219_v15 }
  0x4f   : > { %480 = shalt.err (!%p477_p4)
}
  0x50   : > { %s523_s16 = smov 2048   ;;  %s524_s20 = smov 128  }
  0x51   : > { %375 = dma.vmem_to_hbm [thread:$0]  (%p585_p11), %s282_s28, 4096, %s284_s29, %s269_s30, %s523_s16, %s523_s16, %s524_s20  }
  0x52 PF: > { %s298_s21 = sand.u32 1, %s507_s6   ;;  %p954_p7 = scmp.ge.s32.totalorder %s519_s9, 2 }
  0x53   : > { %s299_s22 = scalar_lea.sflag [#allocation4], %s298_s21 }
  0x54   : > { %p382_p5 = pnand %p954_p7, %p589_p12 }
  0x56   : > { %p383_p8 = pneg %p382_p5 }
  0x58   : > { %502 = dma.done.wait (%p383_p8), %s299_s22, 4096  }
  0x59   : > { %504 = vsyncadd (%p383_p8), %s299_s22, 4294963200  ;;  %p14_p10 = scmp.ge.s32.totalorder %s560_s12, 4   ;;  %s955_s6 = smov %s511_s7 }
  0x5a   : > { %s956_s7 = smov %s515_s8  ;;  %s957_s8 = smov %s572_s15 }
  0x5b   : > { %s958_s9 = smov %s560_s12  ;;  %16 = sbr.rel (!%p14_p10) target bundleno = 5 (0x5), region = 69 }
  0x60   :  { %305 = vsyncpa [#allocation3], 1 }
  0x61   :  { %307 = vsyncpa [#allocation3 + $0x1], 1 }
  0x62   :  { %308 = vsyncpa [#allocation4], 1 }
  0x63   :  { %310 = vsyncpa [#allocation4 + $0x1], 1 }

</bundles_post_ra>
